<compile_context>
chip_gen: v6e
topology: v6e:2x2x1
jax: 0.10.0
libtpu: 0.0.40
codegen_flags: <defaults>
</compile_context>

<pallas_src>
import jax
import jax.numpy as jnp
from jax import lax
from jax.experimental import pallas as pl
from jax.experimental.pallas import tpu as pltpu

EPS = 1e-5
_VMEM_LIMIT = 32 * 1024 * 1024   # explicit scoped-VMEM budget; safe on v5e/v6e/v7x


def _conv_stats_kernel(p_ref, w_ref, y_ref, sum_ref, sq_ref):
    """One M-tile: (tf, Kp) bf16 @ (Kp, 128) bf16 -> f32 on the MXU.
    Streams the raw conv tile out and emits per-tile partial BN statistics."""
    y = jnp.dot(p_ref[...], w_ref[...], preferred_element_type=jnp.float32)
    y_ref[...] = y
    s1 = jnp.sum(y, axis=0)          # (lane,) per folded-channel sum
    s2 = jnp.sum(y * y, axis=0)      # (lane,) per folded-channel sum of squares
    # Stats blocks are (1, 8, lane) so trailing dims stay (8,128)-aligned; rows are
    # redundant broadcast copies, the wrapper reads row 0 only.
    sum_ref[...] = jnp.broadcast_to(s1[None, None, :], sum_ref.shape)
    sq_ref[...] = jnp.broadcast_to(s2[None, None, :], sq_ref.shape)


def _bn_relu_kernel(y_ref, scale_ref, shift_ref, o_ref):
    """Tiled normalize + ReLU: lane-dense fused multiply-add in f32."""
    o_ref[...] = jnp.maximum(y_ref[...] * scale_ref[...] + shift_ref[...], 0.0)


def _im2col(x_nchw, kh, kw, pad):
    """NCHW input -> (N*H*W, Cin*KH*KW) patch matrix (stride 1, SAME padding)."""
    n, cin, h, w = x_nchw.shape
    xp = jnp.pad(x_nchw, ((0, 0), (0, 0), (pad, pad), (pad, pad)))
    cols = []
    for dh in range(kh):
        for dw in range(kw):
            cols.append(xp[:, :, dh:dh + h, dw:dw + w])      # (N, Cin, H, W)
    patches = jnp.stack(cols, axis=2)                        # (N, Cin, KH*KW, H, W)
    patches = patches.transpose(0, 3, 4, 1, 2)               # (N, H, W, Cin, KH*KW)
    return patches.reshape(n * h * w, cin * kh * kw)


def basic_conv2d(x_nchw, conv_w, gamma, beta, *, tf=64):
    """Forward pass equivalent to BasicConv2d(in_c, out_c, kernel_size=3, padding=1)
    in training mode.  `tf` = folded rows per grid step (each folded row = FOLD pixels)."""
    n, cin, h, w = x_nchw.shape
    cout, _, kh, kw = conv_w.shape
    pad = kh // 2

    m_real = n * h * w                 # output pixels (stride 1, SAME)
    k = cin * kh * kw

    # Fold FOLD consecutive output pixels into the lane dim -> 128-wide lane-dense output.
    fold = 128 // cout if (cout <= 128 and 128 % cout == 0) else 1
    lane = fold * cout

    # Host-side im2col (TODO(synk): move in-kernel from NHWC halo tiles).
    patches = _im2col(x_nchw.astype(jnp.float32), kh, kw, pad)        # (M, K) f32

    # Pad M to a multiple of fold*tf (zero rows keep BN stats exact), fold rows into
    # lanes, and pad the contraction dim to a multiple of 128.
    row_mult = fold * tf
    m_pad = pl.cdiv(m_real, row_mult) * row_mult
    patches = jnp.pad(patches, ((0, m_pad - m_real), (0, 0)))
    mf = m_pad // fold
    kb = fold * k
    kp = pl.cdiv(kb, 128) * 128
    pf = patches.reshape(mf, kb)
    pf = jnp.pad(pf, ((0, 0), (0, kp - kb))).astype(jnp.bfloat16)      # (Mf, Kp) bf16

    # Block-diagonal weight so the matmul directly produces the folded layout:
    #   out_folded = pf @ (I_fold (x) Wmat)
    wmat = conv_w.reshape(cout, k).T.astype(jnp.float32)               # (K, Cout)
    w_bd = jnp.kron(jnp.eye(fold, dtype=jnp.float32), wmat)            # (Kb, lane)
    w_bd = jnp.pad(w_bd, ((0, kp - kb), (0, 0))).astype(jnp.bfloat16)  # (Kp, lane) bf16

    g = mf // tf   # grid steps

    # -------- pass 1: streamed conv + per-tile BN statistics --------------------------
    y_folded, psum, psq = pl.pallas_call(
        _conv_stats_kernel,
        out_shape=(
            jax.ShapeDtypeStruct((mf, lane), jnp.float32),     # raw conv, folded layout
            jax.ShapeDtypeStruct((g, 8, lane), jnp.float32),   # per-tile partial sums
            jax.ShapeDtypeStruct((g, 8, lane), jnp.float32),   # per-tile partial sumsq
        ),
        grid_spec=pltpu.PrefetchScalarGridSpec(
            num_scalar_prefetch=0,
            grid=(g,),
            in_specs=[
                pl.BlockSpec((tf, kp), lambda i: (i, 0)),      # streamed patch tile
                pl.BlockSpec((kp, lane), lambda i: (0, 0)),    # resident weight
            ],
            out_specs=[
                pl.BlockSpec((tf, lane), lambda i: (i, 0)),
                pl.BlockSpec((1, 8, lane), lambda i: (i, 0, 0)),
                pl.BlockSpec((1, 8, lane), lambda i: (i, 0, 0)),
            ],
        ),
        compiler_params=pltpu.CompilerParams(
            dimension_semantics=("parallel",),
            vmem_limit_bytes=_VMEM_LIMIT,
        ),
    )(pf, w_bd)

    # -------- tiny per-channel BN finalize in plain JAX (O(Cout) work) -----------------
    sum_c = psum[:, 0, :].sum(axis=0).reshape(fold, cout).sum(axis=0)  # (Cout,)
    sq_c = psq[:, 0, :].sum(axis=0).reshape(fold, cout).sum(axis=0)
    inv_m = 1.0 / m_real
    mean = sum_c * inv_m
    var = sq_c * inv_m - mean * mean            # biased variance (train-mode BN)
    inv_std = lax.rsqrt(var + EPS)
    scale = gamma.astype(jnp.float32) * inv_std
    shift = beta.astype(jnp.float32) - mean * scale
    scale_f = jnp.tile(scale, fold)[None, :]    # (1, lane), matches folded lane order
    shift_f = jnp.tile(shift, fold)[None, :]

    # -------- pass 2: tiled normalize + ReLU -------------------------------------------
    out_folded = pl.pallas_call(
        _bn_relu_kernel,
        out_shape=jax.ShapeDtypeStruct((mf, lane), jnp.float32),
        grid_spec=pltpu.PrefetchScalarGridSpec(
            num_scalar_prefetch=0,
            grid=(g,),
            in_specs=[
                pl.BlockSpec((tf, lane), lambda i: (i, 0)),
                pl.BlockSpec((1, lane), lambda i: (0, 0)),
                pl.BlockSpec((1, lane), lambda i: (0, 0)),
            ],
            out_specs=pl.BlockSpec((tf, lane), lambda i: (i, 0)),
        ),
        compiler_params=pltpu.CompilerParams(
            dimension_semantics=("parallel",),
            vmem_limit_bytes=_VMEM_LIMIT,
        ),
    )(y_folded, scale_f, shift_f)

    # Unfold, strip the padded rows, and return NCHW (PyTorch convention).
    out_flat = out_folded.reshape(m_pad, cout)[:m_real]
    return out_flat.reshape(n, h, w, cout).transpose(0, 3, 1, 2)


def _reference(x_nchw, conv_w, gamma, beta, *, bf16_inputs):
    """Pure-JAX reference (conv -> train-mode BN -> relu).  With bf16_inputs=True the
    conv operands are quantized exactly like the kernel's bf16 MXU operands."""
    xx = x_nchw.astype(jnp.float32)
    ww = conv_w.astype(jnp.float32)
    if bf16_inputs:
        xx = xx.astype(jnp.bfloat16).astype(jnp.float32)
        ww = ww.astype(jnp.bfloat16).astype(jnp.float32)
    y = lax.conv_general_dilated(
        xx, ww, window_strides=(1, 1), padding="SAME",
        dimension_numbers=("NCHW", "OIHW", "NCHW"))
    mean = jnp.mean(y, axis=(0, 2, 3), keepdims=True)
    var = jnp.mean((y - mean) ** 2, axis=(0, 2, 3), keepdims=True)     # biased
    yhat = (y - mean) * lax.rsqrt(var + EPS)
    yhat = yhat * gamma.reshape(1, -1, 1, 1) + beta.reshape(1, -1, 1, 1)
    return jnp.maximum(yhat, 0.0)


if __name__ == "__main__":
    key = jax.random.PRNGKey(0)
    k_x, k_w = jax.random.split(key)

    N, C_IN, C_OUT, H, W = 2, 4, 8, 16, 16
    KH = KW = 3

    x = jax.random.normal(k_x, (N, C_IN, H, W), dtype=jnp.float32)
    conv_w = jax.random.normal(k_w, (C_OUT, C_IN, KH, KW), dtype=jnp.float32) * 0.1
    gamma = jnp.ones((C_OUT,), dtype=jnp.float32)    # fresh BatchNorm2d affine init
    beta = jnp.zeros((C_OUT,), dtype=jnp.float32)

    # Default big tile (1 grid step at this toy size) and a small-tile run that
    # exercises the multi-step pipelined path (4 grid steps).
    out = jax.block_until_ready(basic_conv2d(x, conv_w, gamma, beta))
    out_multi = jax.block_until_ready(basic_conv2d(x, conv_w, gamma, beta, tf=8))

    ref_q = _reference(x, conv_w, gamma, beta, bf16_inputs=True)
    ref_f32 = _reference(x, conv_w, gamma, beta, bf16_inputs=False)

    assert out.shape == (N, C_OUT, H, W)
    # Tight check vs a reference using identically bf16-quantized conv operands.
    assert jnp.allclose(out, ref_q, atol=5e-4, rtol=5e-4), "mismatch vs quantized reference"
    assert jnp.allclose(out_multi, ref_q, atol=5e-4, rtol=5e-4), "multi-tile mismatch"
    # Looser end-to-end check vs the pure-f32 module forward (bf16 MXU operands).
    assert jnp.allclose(out, ref_f32, atol=5e-2, rtol=5e-2), "mismatch vs f32 reference"

    print("KERNEL_OK")
</pallas_src>

<mosaic_0001>
module attributes {stable_mosaic.version = 11 : i64} {
  func.func @_conv_stats_kernel(%arg0: i32, %arg1: memref<64x640xbf16, #tpu.memory_space<vmem>>, %arg2: memref<640x128xbf16, #tpu.memory_space<vmem>>, %arg3: memref<64x128xf32, #tpu.memory_space<vmem>>, %arg4: memref<1x8x128xf32, #tpu.memory_space<vmem>>, %arg5: memref<1x8x128xf32, #tpu.memory_space<vmem>>) attributes {dimension_semantics = [#tpu.dimension_semantics<parallel>], iteration_bounds = array<i64: 1>, scalar_prefetch = 0 : i64, scratch_operands = 0 : i64, tpu.core_type = #tpu.core_type<tc>, window_params = [{transform_indices = @transform_0, window_bounds = array<i64: 64, 640>}, {pipeline_mode = #tpu.pipeline_mode<synchronous>, transform_indices = @transform_1, window_bounds = array<i64: 640, 128>}, {transform_indices = @transform_2, window_bounds = array<i64: 64, 128>}, {transform_indices = @transform_3, window_bounds = array<i64: 1, 8, 128>}, {transform_indices = @transform_4, window_bounds = array<i64: 1, 8, 128>}]} {
    %c0 = arith.constant 0 : index
    %c0_0 = arith.constant 0 : index
    %0 = vector.load %arg1[%c0, %c0_0] : memref<64x640xbf16, #tpu.memory_space<vmem>>, vector<64x640xbf16>
    %c0_1 = arith.constant 0 : index
    %c0_2 = arith.constant 0 : index
    %1 = vector.load %arg2[%c0_1, %c0_2] : memref<640x128xbf16, #tpu.memory_space<vmem>>, vector<640x128xbf16>
    %cst = arith.constant dense<0.000000e+00> : vector<64x128xf32>
    %2 = tpu.matmul %0, %1, %cst {dimension_numbers = #tpu.dot_dimension_numbers<[1], [0], [0], [1], [0, 0, 1, 1], [], []>} : vector<64x640xbf16>, vector<640x128xbf16>, vector<64x128xf32> -> vector<64x128xf32>
    %c0_3 = arith.constant 0 : index
    %c0_4 = arith.constant 0 : index
    %3 = vector.load %arg3[%c0_3, %c0_4] : memref<64x128xf32, #tpu.memory_space<vmem>>, vector<64x128xf32>
    tpu.vector_store %arg3[%c0_3, %c0_4], %2 {strides = array<i32>} : memref<64x128xf32, #tpu.memory_space<vmem>>, vector<64x128xf32>,
    %cst_5 = arith.constant dense<0.000000e+00> : vector<128xf32>
    %4 = vector.multi_reduction <add>, %2, %cst_5 [0] : vector<64x128xf32> to vector<128xf32>
    %5 = arith.mulf %2, %2 : vector<64x128xf32>
    %cst_6 = arith.constant dense<0.000000e+00> : vector<128xf32>
    %6 = vector.multi_reduction <add>, %5, %cst_6 [0] : vector<64x128xf32> to vector<128xf32>
    %7 = vector.shape_cast %4 : vector<128xf32> to vector<1x1x128xf32>
    %8 = vector.shape_cast %7 : vector<1x1x128xf32> to vector<1x1x128xf32>
    %9 = vector.broadcast %8 : vector<1x1x128xf32> to vector<1x8x128xf32>
    %c0_7 = arith.constant 0 : index
    %c0_8 = arith.constant 0 : index
    %c0_9 = arith.constant 0 : index
    %10 = vector.load %arg4[%c0_7, %c0_8, %c0_9] : memref<1x8x128xf32, #tpu.memory_space<vmem>>, vector<1x8x128xf32>
    tpu.vector_store %arg4[%c0_7, %c0_8, %c0_9], %9 {strides = array<i32>} : memref<1x8x128xf32, #tpu.memory_space<vmem>>, vector<1x8x128xf32>,
    %11 = vector.shape_cast %6 : vector<128xf32> to vector<1x1x128xf32>
    %12 = vector.shape_cast %11 : vector<1x1x128xf32> to vector<1x1x128xf32>
    %13 = vector.broadcast %12 : vector<1x1x128xf32> to vector<1x8x128xf32>
    %c0_10 = arith.constant 0 : index
    %c0_11 = arith.constant 0 : index
    %c0_12 = arith.constant 0 : index
    %14 = vector.load %arg5[%c0_10, %c0_11, %c0_12] : memref<1x8x128xf32, #tpu.memory_space<vmem>>, vector<1x8x128xf32>
    tpu.vector_store %arg5[%c0_10, %c0_11, %c0_12], %13 {strides = array<i32>} : memref<1x8x128xf32, #tpu.memory_space<vmem>>, vector<1x8x128xf32>,
    return
  }
  func.func @transform_0(%arg0: i32) -> (i32, i32) {
    %c0_i32 = arith.constant 0 : i32
    %c0_i32_0 = arith.constant 0 : i32
    return %arg0, %c0_i32 : i32, i32
  }
  func.func @transform_1(%arg0: i32) -> (i32, i32) {
    %c0_i32 = arith.constant 0 : i32
    %c0_i32_0 = arith.constant 0 : i32
    %c0_i32_1 = arith.constant 0 : i32
    return %c0_i32, %c0_i32_0 : i32, i32
  }
  func.func @transform_2(%arg0: i32) -> (i32, i32) {
    %c0_i32 = arith.constant 0 : i32
    %c0_i32_0 = arith.constant 0 : i32
    return %arg0, %c0_i32 : i32, i32
  }
  func.func @transform_3(%arg0: i32) -> (i32, i32, i32) {
    %c0_i32 = arith.constant 0 : i32
    %c0_i32_0 = arith.constant 0 : i32
    %c0_i32_1 = arith.constant 0 : i32
    return %arg0, %c0_i32, %c0_i32_0 : i32, i32, i32
  }
  func.func @transform_4(%arg0: i32) -> (i32, i32, i32) {
    %c0_i32 = arith.constant 0 : i32
    %c0_i32_0 = arith.constant 0 : i32
    %c0_i32_1 = arith.constant 0 : i32
    return %arg0, %c0_i32, %c0_i32_0 : i32, i32, i32
  }
}

</mosaic_0001>

<bundles_post_ra>
// kernel: tpu_custom_call.1
= control target key start
LH: loop header
LB: loop body
LE: loop exit
PB: predicated region body
PF: predicated region fallthrough
CT: control target
= control target key end

     0   :  { %10 = vsyncpa [#allocation3], 0  ;;  %s1207_s0 = inlined_call_operand.hbm [shape: bf16[64,640], index: 0, kind: input, shape index: {}]   ;;  %s1208_s1 = inlined_call_operand.hbm [shape: bf16[640,128], index: 1, kind: input, shape index: {}]   ;;  %s1209_s2 = inlined_call_operand.hbm [shape: f32[64,128], index: 2, kind: output, shape index: {0}]   ;;  %s1210_s3 = inlined_call_operand.hbm [shape: f32[1,8,128], index: 3, kind: output, shape index: {1}]   ;;  %s1211_s4 = inlined_call_operand.hbm [shape: f32[1,8,128], index: 4, kind: output, shape index: {2}]  }
   0x1   :  { %11 = vsyncpa [#allocation6], 0 }
   0x2   :  { %12 = vsyncpa [#allocation4], 0 }
   0x3   :  { %13 = vsyncpa [#allocation9], 0  ;;  %s1156_s15 = smov [#allocation2]  }
   0x4   :  { %s19_s16 = sshll.u32 %s1156_s15, 4  ;;  %s20_s16 = int_to_ptr.vmem [resolvable:$true] %s19_s16 }
   0x5   :  { %s1056_s17 = scalar_lea.vmem %s20_s16, 2560  ;;  %p1061_p1 = scmp.lt.s32.totalorder %s20_s16, %s20_s16 }
   0x6   :  { %p1057_p0 = scmp.ne.s32.totalorder %s20_s16, %s1056_s17  ;;  %p1062_p2 = scmp.lt.s32.totalorder %s1056_s17, %s1056_s17 }
   0x8   :  { %p1063_p3 = por %p1062_p2, %p1061_p1 }
   0xa   :  { %p1064_p4 = pnand %p1063_p3, %p1057_p0 }
   0xc   :  { %1067 = shalt.err (!%p1064_p4)
}
   0xd   :  { %s1157_s18 = smov 320   ;;  %s1158_s19 = smov 20  }
   0xe   :  { %25 = dma.hbm_to_vmem [thread:$0]  %s1207_s0, 2560, %s20_s16, [#allocation3], %s1157_s18, %s1157_s18, %s1158_s19  }
   0xf   :  { %s1159_s22 = smov [#allocation5]  }
  0x10   :  { %s31_s23 = sshll.u32 %s1159_s22, 4  ;;  %s32_s23 = int_to_ptr.vmem [resolvable:$true] %s31_s23 }
  0x11   :  { %s1076_s24 = scalar_lea.vmem %s32_s23, 5120  ;;  %p1081_p6 = scmp.lt.s32.totalorder %s32_s23, %s32_s23 }
  0x12   :  { %p1077_p5 = scmp.ne.s32.totalorder %s32_s23, %s1076_s24  ;;  %p1082_p7 = scmp.lt.s32.totalorder %s1076_s24, %s1076_s24 }
  0x14   :  { %p1083_p8 = por %p1082_p7, %p1081_p6 }
  0x16   :  { %p1084_p9 = pnand %p1083_p8, %p1077_p5 }
  0x18   :  { %1087 = shalt.err (!%p1084_p9)
}
  0x19   :  { %s1160_s25 = smov 64   ;;  %s1161_s26 = smov 4  }
  0x1a   :  { %37 = dma.hbm_to_vmem [thread:$0]  %s1208_s1, 5120, %s32_s23, [#allocation6], %s1160_s25, %s1160_s25, %s1161_s26  }
  0x1b   :  { %1148 = dma.done.wait [#allocation3], 2560  }
  0x1c   :  { %1149 = vsyncadd [#allocation3], 4294964736 }
  0x1d   :  { %1150 = dma.done.wait [#allocation6], 5120  }
  0x1e   :  { %1151 = vsyncadd [#allocation6], 4294962176  ;;  %v980_v0 = vld [vmem:[#allocation5 + $0x78] sm:$0xff]   ;;  %v984_v4 = vld [vmem:[#allocation5 + $0x70] sm:$0xff]   ;;  %s1162_s0 = smov [#allocation7]  }
  0x1f   :  { %v981_v1 = vld [vmem:[#allocation5 + $0xf8] sm:$0xff]   ;;  %837 = vmatprep.subr.bf16.mxu0 %v980_v0  ;;  %v985_v5 = vld [vmem:[#allocation5 + $0xf0] sm:$0xff]   ;;  %v988_v8 = vld [vmem:[#allocation5 + $0x68] sm:$0xff]   ;;  %s737_s1 = sshll.u32 %s1162_s0, 4  ;;  %s738_s1 = int_to_ptr.vmem [resolvable:$true] %s737_s1 }
  0x20   :  { %v982_v2 = vld [vmem:[#allocation5 + $0x38] sm:$0xff]   ;;  %877 = vmatprep.subr.bf16.mxu1 %v981_v1  ;;  %v986_v6 = vld [vmem:[#allocation5 + $0x30] sm:$0xff]   ;;  %v989_v9 = vld [vmem:[#allocation5 + $0xe8] sm:$0xff]   ;;  %s1088_s29 = scalar_lea.vmem %s738_s1, 1024  ;;  %p1093_p11 = scmp.lt.s32.totalorder %s738_s1, %s738_s1 }
  0x21   :  { %v983_v3 = vld [vmem:[#allocation5 + $0xb8] sm:$0xff]   ;;  %838 = vmatpush3.bf16.msra.mxu0 %v982_v2  ;;  %v987_v7 = vld [vmem:[#allocation5 + $0xb0] sm:$0xff]   ;;  %v990_v10 = vld [vmem:[#allocation5 + $0x28] sm:$0xff]   ;;  %p1089_p10 = scmp.ne.s32.totalorder %s738_s1, %s1088_s29  ;;  %p1094_p12 = scmp.lt.s32.totalorder %s1088_s29, %s1088_s29 }
  0x22   :  { %878 = vmatpush3.bf16.msra.mxu1 %v983_v3  ;;  %839 = vmatprep.subr.bf16.mxu0 %v984_v4  ;;  %v991_v11 = vld [vmem:[#allocation5 + $0xa8] sm:$0xff]   ;;  %v992_v12 = vld [vmem:[#allocation5 + $0x60] sm:$0xff]   ;;  %v996_v16 = vld [vmem:[#allocation5 + $0x58] sm:$0xff]  }
  0x23   :  { %879 = vmatprep.subr.bf16.mxu1 %v985_v5  ;;  %v993_v13 = vld [vmem:[#allocation5 + $0xe0] sm:$0xff]   ;;  %v997_v17 = vld [vmem:[#allocation5 + $0xd8] sm:$0xff]   ;;  %v1000_v20 = vld [vmem:[#allocation5 + $0x50] sm:$0xff]   ;;  %p1095_p13 = por %p1094_p12, %p1093_p11 }
  0x24   :  { %v994_v14 = vld [vmem:[#allocation5 + $0x20] sm:$0xff]   ;;  %v998_v18 = vld [vmem:[#allocation5 + $0x18] sm:$0xff]   ;;  %v1001_v21 = vld [vmem:[#allocation5 + $0xd0] sm:$0xff]  }
  0x25   :  { %840 = vmatpush3.bf16.msra.mxu0 %v986_v6  ;;  %v995_v15 = vld [vmem:[#allocation5 + $0xa0] sm:$0xff]   ;;  %v999_v19 = vld [vmem:[#allocation5 + $0x98] sm:$0xff]   ;;  %v1002_v22 = vld [vmem:[#allocation5 + $0x10] sm:$0xff]   ;;  %p1096_p0 = pnand %p1095_p13, %p1089_p10 }
  0x26   :  { %880 = vmatpush3.bf16.msra.mxu1 %v987_v7  ;;  %841 = vmatprep.subr.bf16.mxu0 %v988_v8  ;;  %v1003_v23 = vld [vmem:[#allocation5 + $0x90] sm:$0xff]   ;;  %v1004_v24 = vld [vmem:[#allocation5 + $0x48] sm:$0xff]   ;;  %v1008_v28 = vld [vmem:[#allocation5 + $0x40] sm:$0xff]  }
  0x27   :  { %881 = vmatprep.subr.bf16.mxu1 %v989_v9  ;;  %v1005_v25 = vld [vmem:[#allocation5 + $0xc8] sm:$0xff]   ;;  %v1009_v29 = vld [vmem:[#allocation5 + $0xc0] sm:$0xff]   ;;  %v1018_v36 = vld [vmem:[#allocation5 + $0x138] sm:$0xff]  }
  0x28   :  { %v1006_v26 = vld [vmem:[#allocation5 + $0x8] sm:$0xff]   ;;  %v1010_v30 = vld [vmem:[#allocation5] sm:$0xff]   ;;  %v1019_v37 = vld [vmem:[#allocation5 + $0x130] sm:$0xff]  }
  0x29   :  { %842 = vmatpush3.bf16.msra.mxu0 %v990_v10  ;;  %v1007_v27 = vld [vmem:[#allocation5 + $0x88] sm:$0xff]   ;;  %v1011_v31 = vld [vmem:[#allocation5 + $0x80] sm:$0xff]   ;;  %v1030_v45 = vld [vmem:[#allocation2 + $0x5c] ss:$20 sps:$4 sm:$0xff]  }
  0x2a   :  { %882 = vmatpush3.bf16.msra.mxu1 %v991_v11  ;;  %843 = vmatprep.subr.bf16.mxu0 %v992_v12  ;;  %v1012_v32 = vld [vmem:[#allocation2] ss:$20 sps:$4 sm:$0xff]   ;;  %v1014_v33 = vld [vmem:[#allocation2 + $0x4] ss:$20 sps:$4 sm:$0xff]   ;;  %v1015_v34 = vld [vmem:[#allocation2 + $0x8] ss:$20 sps:$4 sm:$0xff]  }
  0x2b   :  { %883 = vmatprep.subr.bf16.mxu1 %v993_v13  ;;  %v1017_v35 = vld [vmem:[#allocation2 + $0xc] ss:$20 sps:$4 sm:$0xff]   ;;  %525 = vmatprep.mubr.bf16.mxu0 %v1014_v33  ;;  %v1022_v39 = vld [vmem:[#allocation2 + $0x34] ss:$20 sps:$4 sm:$0xff]   ;;  %v1025_v42 = vld [vmem:[#allocation2 + $0x30] ss:$20 sps:$4 sm:$0xff]  }
  0x2c   :  { %590 = vmatprep.mubr.bf16.mxu1 %v1017_v35  ;;  %v1020_v38 = vld [vmem:[#allocation2 + $0x2c] ss:$20 sps:$4 sm:$0xff]   ;;  %v1024_v40 = vld [vmem:[#allocation2 + $0x28] ss:$20 sps:$4 sm:$0xff]   ;;  %v1032_v47 = vld [vmem:[#allocation2 + $0x50] ss:$20 sps:$4 sm:$0xff]  }
  0x2d   :  { %844 = vmatpush3.bf16.msra.mxu0 %v994_v14  ;;  %v1026_v41 = vld [vmem:[#allocation5 + $0x128] sm:$0xff]   ;;  %v1027_v44 = vld [vmem:[#allocation5 + $0x120] sm:$0xff]   ;;  %v1034_v46 = vld [vmem:[#allocation5 + $0x118] sm:$0xff]  }
  0x2e   :  { %884 = vmatpush3.bf16.msra.mxu1 %v995_v15  ;;  %845 = vmatprep.subr.bf16.mxu0 %v996_v16  ;;  %v1028_v43 = vld [vmem:[#allocation2 + $0x54] ss:$20 sps:$4 sm:$0xff]   ;;  %v1033_v48 = vld [vmem:[#allocation2 + $0x58] ss:$20 sps:$4 sm:$0xff]   ;;  %v1036_v49 = vld [vmem:[#allocation2 + $0x7c] ss:$20 sps:$4 sm:$0xff]  }
  0x2f   :  { %885 = vmatprep.subr.bf16.mxu1 %v997_v17  ;;  %v1038_v50 = vld [vmem:[#allocation2 + $0x84] ss:$20 sps:$4 sm:$0xff]   ;;  %v1035_v51 = vld [vmem:[#allocation5 + $0x110] sm:$0xff]   ;;  %v1042_v52 = vld [vmem:[#allocation5 + $0x108] sm:$0xff]  }
  0x30   :  { %v1040_v53 = vld [vmem:[#allocation2 + $0x78] ss:$20 sps:$4 sm:$0xff]   ;;  %v1041_v54 = vld [vmem:[#allocation2 + $0x80] ss:$20 sps:$4 sm:$0xff]   ;;  %v1044_v55 = vld [vmem:[#allocation2 + $0x10] ss:$20 sps:$4 sm:$0xff]  }
  0x31   :  { %846 = vmatpush3.bf16.msra.mxu0 %v998_v18  ;;  %v1045_v56 = vld [vmem:[#allocation2 + $0x60] ss:$20 sps:$4 sm:$0xff]   ;;  %v1046_v58 = vld [vmem:[#allocation2 + $0x38] ss:$20 sps:$4 sm:$0xff]   ;;  %v1047_v59 = vld [vmem:[#allocation2 + $0x88] ss:$20 sps:$4 sm:$0xff]  }
  0x32   :  { %886 = vmatpush3.bf16.msra.mxu1 %v999_v19  ;;  %847 = vmatprep.subr.bf16.mxu0 %v1000_v20  ;;  %v1043_v57 = vld [vmem:[#allocation5 + $0x100] sm:$0xff]  }
  0x33   :  { %887 = vmatprep.subr.bf16.mxu1 %v1001_v21 }
  0x35   :  { %848 = vmatpush3.bf16.msra.mxu0 %v1002_v22 }
  0x36   :  { %888 = vmatpush3.bf16.msra.mxu1 %v1003_v23  ;;  %849 = vmatprep.subr.bf16.mxu0 %v1004_v24 }
  0x37   :  { %889 = vmatprep.subr.bf16.mxu1 %v1005_v25 }
  0x39   :  { %850 = vmatpush3.bf16.msra.mxu0 %v1006_v26 }
  0x3a   :  { %890 = vmatpush3.bf16.msra.mxu1 %v1007_v27  ;;  %851 = vmatprep.subr.bf16.mxu0 %v1008_v28 }
  0x3b   :  { %891 = vmatprep.subr.bf16.mxu1 %v1009_v29 }
  0x3d   :  { %852 = vmatpush3.bf16.msra.mxu0 %v1010_v30 }
  0x3e   :  { %892 = vmatpush3.bf16.msra.mxu1 %v1011_v31  ;;  %929 = vmatprep.subr.bf16.mxu0 %v1018_v36 }
  0x3f   :  { %953 = vmatprep.subr.bf16.mxu1 %v1018_v36 }
  0x40   :  { %526 = vmatmul.mubr.bf16.vlgmr.msra.gmra.mxu0 %v1012_v32 }
  0x41   :  { %591 = vmatmul.mubr.bf16.vlgmr.msra.gmra.mxu1 %v1015_v34  ;;  %930 = vmatpush3.bf16.msra.mxu0 %v1018_v36 }
  0x42   :  { %961 = vmatpush3.bf16.msra.mxu1 %v1018_v36  ;;  %931 = vmatprep.subr.bf16.mxu0 %v1019_v37 }
  0x43   :  { %954 = vmatprep.subr.bf16.mxu1 %v1019_v37  ;;  %533 = vmatprep.mubr.bf16.mxu0 %v1020_v38 }
  0x44   :  { %598 = vmatprep.mubr.bf16.mxu1 %v1022_v39 }
  0x45   :  { %932 = vmatpush3.bf16.msra.mxu0 %v1019_v37 }
  0x46   :  { %962 = vmatpush3.bf16.msra.mxu1 %v1019_v37  ;;  %933 = vmatprep.subr.bf16.mxu0 %v1026_v41 }
  0x47   :  { %955 = vmatprep.subr.bf16.mxu1 %v1026_v41 }
  0x48   :  { %534 = vmatmul.mubr.bf16.gmra.mxu0 %v1024_v40 }
  0x49   :  { %599 = vmatmul.mubr.bf16.gmra.mxu1 %v1025_v42  ;;  %541 = vmatprep.mubr.bf16.mxu0 %v1028_v43 }
  0x4a   :  { %934 = vmatpush3.bf16.msra.mxu0 %v1026_v41  ;;  %606 = vmatprep.mubr.bf16.mxu1 %v1030_v45 }
  0x4b   :  { %963 = vmatpush3.bf16.msra.mxu1 %v1026_v41  ;;  %935 = vmatprep.subr.bf16.mxu0 %v1027_v44 }
  0x4c   :  { %956 = vmatprep.subr.bf16.mxu1 %v1027_v44 }
  0x4e   :  { %936 = vmatpush3.bf16.msra.mxu0 %v1027_v44 }
  0x4f   :  { %964 = vmatpush3.bf16.msra.mxu1 %v1027_v44  ;;  %937 = vmatprep.subr.bf16.mxu0 %v1034_v46 }
  0x50   :  { %542 = vmatmul.mubr.bf16.gmra.mxu0 %v1032_v47  ;;  %957 = vmatprep.subr.bf16.mxu1 %v1034_v46 }
  0x51   :  { %607 = vmatmul.mubr.bf16.gmra.mxu1 %v1033_v48  ;;  %549 = vmatprep.mubr.bf16.mxu0 %v1036_v49 }
  0x52   :  { %938 = vmatpush3.bf16.msra.mxu0 %v1034_v46  ;;  %614 = vmatprep.mubr.bf16.mxu1 %v1038_v50 }
  0x53   :  { %965 = vmatpush3.bf16.msra.mxu1 %v1034_v46  ;;  %939 = vmatprep.subr.bf16.mxu0 %v1035_v51 }
  0x54   :  { %958 = vmatprep.subr.bf16.mxu1 %v1035_v51 }
  0x56   :  { %940 = vmatpush3.bf16.msra.mxu0 %v1035_v51 }
  0x57   :  { %966 = vmatpush3.bf16.msra.mxu1 %v1035_v51  ;;  %941 = vmatprep.subr.bf16.mxu0 %v1042_v52 }
  0x58   :  { %550 = vmatmul.mubr.bf16.gmra.mxu0 %v1040_v53  ;;  %959 = vmatprep.subr.bf16.mxu1 %v1042_v52 }
  0x59   :  { %615 = vmatmul.mubr.bf16.gmra.mxu1 %v1041_v54  ;;  %945 = vmatprep.mubr.bf16.mxu0 %v1044_v55 }
  0x5a   :  { %942 = vmatpush3.bf16.msra.mxu0 %v1042_v52  ;;  %949 = vmatprep.mubr.bf16.mxu1 %v1045_v56 }
  0x5b   :  { %967 = vmatpush3.bf16.msra.mxu1 %v1042_v52  ;;  %943 = vmatprep.subr.bf16.mxu0 %v1043_v57 }
  0x5c   :  { %960 = vmatprep.subr.bf16.mxu1 %v1043_v57 }
  0x5e   :  { %944 = vmatpush3.bf16.msra.mxu0 %v1043_v57 }
  0x5f   :  { %968 = vmatpush3.bf16.msra.mxu1 %v1043_v57 }
  0x61   :  { %946 = vmatmul.mubr.bf16.vlgmr.msra.gmra.mxu0 %v1046_v58 }
  0x62   :  { %950 = vmatmul.mubr.bf16.vlgmr.msra.gmra.mxu1 %v1047_v59 }
 0x100   :  { %v853_v60 = vpop.f32.mrf.mxu0 }
 0x101   :  { %v893_v61 = vpop.f32.mrf.mxu1 }
 0x102   :  { %v854_v62 = vpop.f32.mrf.mxu0 }
 0x103   :  { %v894_v63 = vpop.f32.mrf.mxu1  ;;  %v855_v30 = vadd.f32 %v854_v62, %v853_v60 }
 0x104   :  { %v856_v0 = vpop.f32.mrf.mxu0  ;;  %v895_v31 = vadd.f32 %v894_v63, %v893_v61 }
 0x105   :  { %v896_v1 = vpop.f32.mrf.mxu1 }
 0x106   :  { %v857_v2 = vpop.f32.mrf.mxu0  ;;  %v593_v47 = vadd.f32 %v895_v31, %v855_v30 }
 0x107   :  { %v897_v3 = vpop.f32.mrf.mxu1  ;;  %v858_v43 = vadd.f32 %v857_v2, %v856_v0 }
 0x108   :  { %v859_v4 = vpop.f32.mrf.mxu0  ;;  %v898_v44 = vadd.f32 %v897_v3, %v896_v1 }
 0x109   :  { %v899_v5 = vpop.f32.mrf.mxu1 }
 0x10a   :  { %v860_v6 = vpop.f32.mrf.mxu0  ;;  %v596_v61 = vadd.f32 %v898_v44, %v858_v43 }
 0x10b   :  { %v900_v7 = vpop.f32.mrf.mxu1  ;;  %v861_v24 = vadd.f32 %v860_v6, %v859_v4 }
 0x10c   :  { %v862_v8 = vpop.f32.mrf.mxu0  ;;  %v901_v25 = vadd.f32 %v900_v7, %v899_v5 }
 0x10d   :  { %v902_v9 = vpop.f32.mrf.mxu1 }
 0x10e   :  { %v863_v10 = vpop.f32.mrf.mxu0  ;;  %v601_v38 = vadd.f32 %v901_v25, %v861_v24 }
 0x10f   :  { %v903_v11 = vpop.f32.mrf.mxu1  ;;  %v864_v36 = vadd.f32 %v863_v10, %v862_v8 }
 0x110   :  { %v865_v12 = vpop.f32.mrf.mxu0  ;;  %v904_v37 = vadd.f32 %v903_v11, %v902_v9 }
 0x111   :  { %v905_v13 = vpop.f32.mrf.mxu1 }
 0x112   :  { %v866_v14 = vpop.f32.mrf.mxu0  ;;  %v604_v55 = vadd.f32 %v904_v37, %v864_v36 }
 0x113   :  { %v906_v15 = vpop.f32.mrf.mxu1  ;;  %v867_v33 = vadd.f32 %v866_v14, %v865_v12 }
 0x114   :  { %v868_v16 = vpop.f32.mrf.mxu0  ;;  %v907_v34 = vadd.f32 %v906_v15, %v905_v13 }
 0x115   :  { %v908_v17 = vpop.f32.mrf.mxu1 }
 0x116   :  { %v869_v18 = vpop.f32.mrf.mxu0  ;;  %v609_v52 = vadd.f32 %v907_v34, %v867_v33 }
 0x117   :  { %v909_v19 = vpop.f32.mrf.mxu1  ;;  %v870_v48 = vadd.f32 %v869_v18, %v868_v16 }
 0x118   :  { %v871_v20 = vpop.f32.mrf.mxu0  ;;  %v910_v49 = vadd.f32 %v909_v19, %v908_v17 }
 0x119   :  { %v911_v21 = vpop.f32.mrf.mxu1 }
 0x11a   :  { %v872_v22 = vpop.f32.mrf.mxu0  ;;  %v612_v0 = vadd.f32 %v910_v49, %v870_v48 }
 0x11b   :  { %v912_v23 = vpop.f32.mrf.mxu1  ;;  %v873_v27 = vadd.f32 %v872_v22, %v871_v20 }
 0x11c   :  { %v874_v26 = vpop.f32.mrf.mxu0  ;;  %v913_v28 = vadd.f32 %v912_v23, %v911_v21 }
 0x11d   :  { %v914_v29 = vpop.f32.mrf.mxu1 }
 0x11e   :  { %v875_v32 = vpop.f32.mrf.mxu0  ;;  %v617_v42 = vadd.f32 %v913_v28, %v873_v27 }
 0x11f   :  { %v915_v35 = vpop.f32.mrf.mxu1  ;;  %v876_v39 = vadd.f32 %v875_v32, %v874_v26 }
 0x120   :  { %v916_v40 = vadd.f32 %v915_v35, %v914_v29 }
 0x121   :  { %v947_v41 = vpop.f32.mrf.mxu0 }
 0x122   :  { %v666_v45 = vadd.f32 %v947_v41, %v601_v38  ;;  %v951_v46 = vpop.f32.mrf.mxu1  ;;  %v620_v58 = vadd.f32 %v916_v40, %v876_v39 }
 0x123   :  { %v682_v50 = vadd.f32 %v951_v46, %v617_v42  ;;  %v657_v51 = vpop.f32.mrf.mxu0 }
 0x124   :  { %690 = vst [vmem:[#allocation7 + $0x10] sm:$0xff] %v666_v45  ;;  %v658_v53 = vadd.f32 %v657_v51, %v593_v47  ;;  %v673_v54 = vpop.f32.mrf.mxu1  ;;  %v711_v7 = vmul.f32 %v666_v45, %v666_v45 }
 0x125   :  { %694 = vst [vmem:[#allocation7 + $0x30] sm:$0xff] %v682_v50  ;;  %v674_v56 = vadd.f32 %v673_v54, %v609_v52  ;;  %v948_v57 = vpop.f32.mrf.mxu0 }
 0x126   :  { %688 = vst [vmem:[#allocation7] sm:$0xff] %v658_v53  ;;  %v669_v59 = vadd.f32 %v948_v57, %v604_v55  ;;  %v952_v60 = vpop.f32.mrf.mxu1  ;;  %v709_v4 = vmul.f32 %v658_v53, %v658_v53 }
 0x127   :  { %692 = vst [vmem:[#allocation7 + $0x20] sm:$0xff] %v674_v56  ;;  %v685_v62 = vadd.f32 %v952_v60, %v620_v58  ;;  %v660_v63 = vpop.f32.mrf.mxu0 }
 0x128   :  { %691 = vst [vmem:[#allocation7 + $0x18] sm:$0xff] %v669_v59  ;;  %v661_v1 = vadd.f32 %v660_v63, %v596_v61  ;;  %v676_v2 = vpop.f32.mrf.mxu1 }
 0x129   :  { %695 = vst [vmem:[#allocation7 + $0x38] sm:$0xff] %v685_v62  ;;  %v677_v3 = vadd.f32 %v676_v2, %v612_v0 }
 0x12a   :  { %689 = vst [vmem:[#allocation7 + $0x8] sm:$0xff] %v661_v1  ;;  %v696_v5 = vadd.f32 %v661_v1, %v658_v53  ;;  %v710_v6 = vmul.f32 %v661_v1, %v661_v1 }
 0x12b   :  { %693 = vst [vmem:[#allocation7 + $0x28] sm:$0xff] %v677_v3 }
 0x12c   :  { %v697_v8 = vadd.f32 %v696_v5, %v666_v45  ;;  %v717_v9 = vadd.f32 %v710_v6, %v709_v4 }
 0x12d   :  { %1099 = shalt.err (!%p1096_p0)
}
 0x12e   :  { %s1163_s30 = smov 128   ;;  %s1164_s5 = smov 8   ;;  %v712_v10 = vmul.f32 %v669_v59, %v669_v59  ;;  %v718_v11 = vadd.f32 %v717_v9, %v711_v7  ;;  %v698_v12 = vadd.f32 %v697_v8, %v669_v59  ;;  %v713_v13 = vmul.f32 %v674_v56, %v674_v56 }
 0x12f   :  { %743 = dma.vmem_to_hbm [thread:$0]  %s738_s1, 1024, %s1209_s2, [#allocation4], %s1163_s30, %s1163_s30, %s1164_s5   ;;  %v714_v17 = vmul.f32 %v677_v3, %v677_v3  ;;  %v715_v19 = vmul.f32 %v682_v50, %v682_v50  ;;  %v716_v22 = vmul.f32 %v685_v62, %v685_v62 }
 0x130   :  { %v699_v14 = vadd.f32 %v698_v12, %v674_v56  ;;  %v719_v15 = vadd.f32 %v718_v11, %v712_v10  ;;  %s1165_s2 = smov [#allocation8]   ;;  %s1166_s9 = smov [#allocation10]  }
 0x131   :  { %s750_s8 = sshll.u32 %s1165_s2, 4  ;;  %s760_s10 = sshll.u32 %s1166_s9, 4  ;;  %s751_s8 = int_to_ptr.vmem [resolvable:$true] %s750_s8  ;;  %s761_s10 = int_to_ptr.vmem [resolvable:$true] %s760_s10 }
 0x132   :  { %v700_v16 = vadd.f32 %v699_v14, %v677_v3  ;;  %v720_v18 = vadd.f32 %v719_v15, %v713_v13  ;;  %s1108_s11 = scalar_lea.vmem %s751_s8, 128  ;;  %p1113_p2 = scmp.lt.s32.totalorder %s751_s8, %s751_s8 }
 0x133   :  { %p1109_p1 = scmp.ne.s32.totalorder %s751_s8, %s1108_s11  ;;  %p1114_p3 = scmp.lt.s32.totalorder %s1108_s11, %s1108_s11 }
 0x134   :  { %v701_v20 = vadd.f32 %v700_v16, %v682_v50  ;;  %v721_v21 = vadd.f32 %v720_v18, %v714_v17 }
 0x135   :  { %p1115_p4 = por %p1114_p3, %p1113_p2 }
 0x136   :  { %v702_v23 = vadd.f32 %v701_v20, %v685_v62  ;;  %v722_v24 = vadd.f32 %v721_v21, %v715_v19 }
 0x137   :  { %p1116_p5 = pnand %p1115_p4, %p1109_p1 }
 0x138   :  { %v723_v25 = vadd.f32 %v722_v24, %v716_v22  ;;  %v703_v26 = vrot.slane %v702_v23, 4 }
 0x13a   :  { %v704_v27 = vadd.f32 %v703_v26, %v702_v23  ;;  %v724_v28 = vrot.slane %v723_v25, 4 }
 0x13c   :  { %v705_v29 = vrot.slane %v704_v27, 2  ;;  %v725_v30 = vadd.f32 %v724_v28, %v723_v25 }
 0x13e   :  { %v706_v31 = vadd.f32 %v705_v29, %v704_v27  ;;  %v726_v32 = vrot.slane %v725_v30, 2 }
 0x140   :  { %v707_v33 = vrot.slane %v706_v31, 1  ;;  %v727_v34 = vadd.f32 %v726_v32, %v725_v30 }
 0x142   :  { %v708_v35 = vadd.f32 %v707_v33, %v706_v31  ;;  %v728_v36 = vrot.slane %v727_v34, 1 }
 0x144   :  { %730 = vst [vmem:[#allocation8] sm:$0xff] %v708_v35  ;;  %v729_v37 = vadd.f32 %v728_v36, %v727_v34 }
 0x145   :  { %1119 = shalt.err (!%p1116_p5)
}
 0x146   :  { %753 = dma.vmem_to_hbm [thread:$0]  %s751_s8, 128, %s1210_s3, [#allocation9]   ;;  %731 = vst [vmem:[#allocation10] sm:$0xff] %v729_v37 }
 0x147   :  { %s1128_s14 = scalar_lea.vmem %s761_s10, 128  ;;  %p1133_p7 = scmp.lt.s32.totalorder %s761_s10, %s761_s10 }
 0x148   :  { %p1129_p6 = scmp.ne.s32.totalorder %s761_s10, %s1128_s14  ;;  %p1134_p8 = scmp.lt.s32.totalorder %s1128_s14, %s1128_s14 }
 0x14a   :  { %p1135_p9 = por %p1134_p8, %p1133_p7 }
 0x14c   :  { %p1136_p10 = pnand %p1135_p9, %p1129_p6 }
 0x14e   :  { %1139 = shalt.err (!%p1136_p10)
}
 0x14f   :  { %763 = dma.vmem_to_hbm [thread:$0]  %s761_s10, 128, %s1211_s4, [#allocation9]  }
 0x150   :  { %1152 = dma.done.wait [#allocation4], 1024  }
 0x151   :  { %1153 = vsyncadd [#allocation4], 4294966272 }
 0x152   :  { %1154 = dma.done.wait [#allocation9], 256  }
 0x153   :  { %1155 = vsyncadd [#allocation9], 4294967040 }
 0x154   :  { %773 = vsyncpa [#allocation3], 1 }
 0x155   :  { %774 = vsyncpa [#allocation6], 1 }
 0x156   :  { %775 = vsyncpa [#allocation4], 1 }
 0x157   :  { %776 = vsyncpa [#allocation9], 1 }

</bundles_post_ra>
